<compile_context>
chip_gen: v7x
topology: tpu7x:2x2x1
jax: 0.10.0
libtpu: 0.0.40
codegen_flags: <defaults>
</compile_context>

<pallas_src>
import functools

import jax
import jax.numpy as jnp
from jax.experimental import pallas as pl
from jax.experimental.pallas import tpu as pltpu


def _round_up(a, m):
    return ((a + m - 1) // m) * m


def _pick_tile(n, requested):
    """Multiple-of-128 batch tile; keep >= 2 grid steps when n allows (v7x)."""
    req = max(128, _round_up(int(requested), 128))
    if n <= 128:
        return 128
    half = max(128, ((_round_up(n, 128) // 2) // 128) * 128)
    return min(req, half)


def _mlp3_kernel(x_ref,
                 w0_ref, b0_ref,
                 w1_ref, b1_ref,
                 w2_ref, b2_ref,
                 w3c_ref, b3_ref,
                 o_ref, *, use_bf16):
    """Forward pass for one batch tile. Activations are (features, tile)."""
    indim = x_ref.shape[0]
    outdim = o_ref.shape[0]
    mm_dtype = jnp.bfloat16 if use_bf16 else jnp.float32

    # ---- input layer + tanh: K = indim is tiny, use unrolled VPU FMAs ----
    if indim <= 8:
        acc = w0_ref[:, 0:1] * x_ref[0:1, :]              # (h0,1)*(1,T) -> (h0,T)
        for k in range(1, indim):
            acc = acc + w0_ref[:, k:k + 1] * x_ref[k:k + 1, :]
    else:
        acc = jnp.dot(w0_ref[...], x_ref[...],
                      preferred_element_type=jnp.float32)
    h = jnp.tanh(acc + b0_ref[...])                        # (h0, T)

    # ---- hidden layers + tanh: (h, h) @ (h, T) -> lane-dense (h, T) ----
    def dense_tanh(w_ref, b_ref, h):
        z = jnp.dot(w_ref[...].astype(mm_dtype), h.astype(mm_dtype),
                    preferred_element_type=jnp.float32)
        return jnp.tanh(z + b_ref[...])

    h = dense_tanh(w1_ref, b1_ref, h)                      # (h1, T)
    h = dense_tanh(w2_ref, b2_ref, h)                      # (h2, T)

    # ---- output layer (linear / identity) ----
    if outdim == 1:
        # XLU sublane reduction instead of an M=1 MXU matmul; stays lane-dense.
        out = jnp.sum(w3c_ref[...] * h, axis=0, keepdims=True) + b3_ref[...]
    else:
        out = jax.lax.dot_general(
            w3c_ref[...], h, (((0,), (0,)), ((), ())),
            preferred_element_type=jnp.float32) + b3_ref[...]
    o_ref[...] = out.astype(o_ref.dtype)                   # (outdim, T), lane-dense


@functools.partial(jax.jit, static_argnames=("batch_tile", "use_bf16"))
def net_3hidden_forward(x, params, *, batch_tile=1024, use_bf16=False):
    """x: (N, indim). params: torch-layout weights w_i (out,in), biases b_i (out,1)."""
    n, indim = x.shape
    w0, b0 = params["w0"], params["b0"]
    w1, b1 = params["w1"], params["b1"]
    w2, b2 = params["w2"], params["b2"]
    w3, b3 = params["w3"], params["b3"]
    outdim = w3.shape[0]

    tile = _pick_tile(n, batch_tile)
    n_pad = _round_up(n, tile)
    grid = (n_pad // tile,)

    # Lane-dense plumbing: put the batch on the lane axis for both ends.
    xt = x.T                                               # (indim, n)
    if n_pad != n:
        xt = jnp.pad(xt, ((0, 0), (0, n_pad - n)))
    w3c = w3.T                                             # (h2, outdim) column

    def whole(arr):  # grid-invariant block: full array, never re-fetched
        return pl.BlockSpec(arr.shape, lambda i: (0, 0))

    out_t = pl.pallas_call(
        functools.partial(_mlp3_kernel, use_bf16=use_bf16),
        out_shape=jax.ShapeDtypeStruct((outdim, n_pad), x.dtype),
        grid_spec=pltpu.PrefetchScalarGridSpec(
            num_scalar_prefetch=0,
            grid=grid,
            in_specs=[
                pl.BlockSpec((indim, tile), lambda i: (0, i)),   # x (transposed)
                whole(w0), whole(b0),
                whole(w1), whole(b1),
                whole(w2), whole(b2),
                whole(w3c), whole(b3),
            ],
            out_specs=pl.BlockSpec((outdim, tile), lambda i: (0, i)),
        ),
        compiler_params=pltpu.CompilerParams(
            dimension_semantics=("parallel",)),
    )(xt, w0, b0, w1, b1, w2, b2, w3c, b3)

    return out_t[:, :n].T                                  # back to (n, outdim)


def init_params(key, indim, hidden_layer, outdim, dtype=jnp.float32):
    """torch.nn.Linear-style init: W (out,in), b (out,1), U(-1/sqrt(fan_in), +)."""
    sizes = [indim] + list(hidden_layer) + [outdim]
    params = {}
    for li, (fan_in, fan_out) in enumerate(zip(sizes[:-1], sizes[1:])):
        key, kw, kb = jax.random.split(key, 3)
        bound = 1.0 / float(fan_in) ** 0.5
        params[f"w{li}"] = jax.random.uniform(kw, (fan_out, fan_in), dtype, -bound, bound)
        params[f"b{li}"] = jax.random.uniform(kb, (fan_out, 1), dtype, -bound, bound)
    return params


def reference_forward(x, params):
    h = jnp.tanh(x @ params["w0"].T + params["b0"].T)
    h = jnp.tanh(h @ params["w1"].T + params["b1"].T)
    h = jnp.tanh(h @ params["w2"].T + params["b2"].T)
    return h @ params["w3"].T + params["b3"].T


if __name__ == "__main__":
    key = jax.random.PRNGKey(0)

    # Net_3Hidden(indim=2, outdim=1, hidden_layer=[32, 32, 32], tanh/tanh/linear)
    indim, outdim = 2, 1
    hidden_layer = [32, 32, 32]
    batch = 500   # not a multiple of 128: exercises the pad/ragged path; grid = 2

    kx, kp = jax.random.split(key)
    x = jax.random.normal(kx, (batch, indim), jnp.float32)
    params = init_params(kp, indim, hidden_layer, outdim)

    ref = reference_forward(x, params)

    # f32 path (exact semantics of the PyTorch module)
    out = jax.block_until_ready(net_3hidden_forward(x, params))
    assert out.shape == (batch, outdim)
    assert jnp.allclose(out, ref, atol=1e-4, rtol=1e-4), "f32 mismatch vs pure-JAX reference"

    # bf16 hidden-matmul fast path (v6e-oriented); looser tolerance by design
    out_bf16 = jax.block_until_ready(net_3hidden_forward(x, params, use_bf16=True))
    assert out_bf16.shape == (batch, outdim)
    assert jnp.allclose(out_bf16, ref, atol=5e-2, rtol=5e-2), "bf16 mismatch vs reference"

    print("KERNEL_OK")
</pallas_src>

<mosaic_0001>
module attributes {stable_mosaic.version = 11 : i64} {
  func.func @_mlp3_kernel(%arg0: i32, %arg1: memref<2x256xf32, #tpu.memory_space<vmem>>, %arg2: memref<32x2xf32, #tpu.memory_space<vmem>>, %arg3: memref<32x1xf32, #tpu.memory_space<vmem>>, %arg4: memref<32x32xf32, #tpu.memory_space<vmem>>, %arg5: memref<32x1xf32, #tpu.memory_space<vmem>>, %arg6: memref<32x32xf32, #tpu.memory_space<vmem>>, %arg7: memref<32x1xf32, #tpu.memory_space<vmem>>, %arg8: memref<32x1xf32, #tpu.memory_space<vmem>>, %arg9: memref<1x1xf32, #tpu.memory_space<vmem>>, %arg10: memref<1x256xf32, #tpu.memory_space<vmem>>) attributes {dimension_semantics = [#tpu.dimension_semantics<parallel>], iteration_bounds = array<i64: 2>, scalar_prefetch = 0 : i64, scratch_operands = 0 : i64, tpu.core_type = #tpu.core_type<tc>, window_params = [{transform_indices = @transform_0, window_bounds = array<i64: 2, 256>}, {pipeline_mode = #tpu.pipeline_mode<synchronous>, transform_indices = @transform_1, window_bounds = array<i64: 32, 2>}, {pipeline_mode = #tpu.pipeline_mode<synchronous>, transform_indices = @transform_2, window_bounds = array<i64: 32, 1>}, {pipeline_mode = #tpu.pipeline_mode<synchronous>, transform_indices = @transform_3, window_bounds = array<i64: 32, 32>}, {pipeline_mode = #tpu.pipeline_mode<synchronous>, transform_indices = @transform_4, window_bounds = array<i64: 32, 1>}, {pipeline_mode = #tpu.pipeline_mode<synchronous>, transform_indices = @transform_5, window_bounds = array<i64: 32, 32>}, {pipeline_mode = #tpu.pipeline_mode<synchronous>, transform_indices = @transform_6, window_bounds = array<i64: 32, 1>}, {pipeline_mode = #tpu.pipeline_mode<synchronous>, transform_indices = @transform_7, window_bounds = array<i64: 32, 1>}, {pipeline_mode = #tpu.pipeline_mode<synchronous>, transform_indices = @transform_8, window_bounds = array<i64: 1, 1>}, {transform_indices = @transform_9, window_bounds = array<i64: 1, 256>}]} {
    %c0 = arith.constant 0 : index
    %c0_0 = arith.constant 0 : index
    %0 = vector.load %arg2[%c0, %c0_0] : memref<32x2xf32, #tpu.memory_space<vmem>>, vector<32x1xf32>
    %c0_1 = arith.constant 0 : index
    %c0_2 = arith.constant 0 : index
    %1 = vector.load %arg1[%c0_1, %c0_2] : memref<2x256xf32, #tpu.memory_space<vmem>>, vector<1x256xf32>
    %2 = vector.broadcast %0 : vector<32x1xf32> to vector<32x256xf32>
    %3 = vector.broadcast %1 : vector<1x256xf32> to vector<32x256xf32>
    %4 = arith.mulf %2, %3 : vector<32x256xf32>
    %c0_3 = arith.constant 0 : index
    %c1 = arith.constant 1 : index
    %5 = vector.load %arg2[%c0_3, %c1] : memref<32x2xf32, #tpu.memory_space<vmem>>, vector<32x1xf32>
    %c1_4 = arith.constant 1 : index
    %c0_5 = arith.constant 0 : index
    %6 = vector.load %arg1[%c1_4, %c0_5] : memref<2x256xf32, #tpu.memory_space<vmem>>, vector<1x256xf32>
    %7 = vector.broadcast %5 : vector<32x1xf32> to vector<32x256xf32>
    %8 = vector.broadcast %6 : vector<1x256xf32> to vector<32x256xf32>
    %9 = arith.mulf %7, %8 : vector<32x256xf32>
    %10 = arith.addf %4, %9 : vector<32x256xf32>
    %c0_6 = arith.constant 0 : index
    %c0_7 = arith.constant 0 : index
    %11 = vector.load %arg3[%c0_6, %c0_7] : memref<32x1xf32, #tpu.memory_space<vmem>>, vector<32x1xf32>
    %12 = vector.broadcast %11 : vector<32x1xf32> to vector<32x256xf32>
    %13 = arith.addf %10, %12 : vector<32x256xf32>
    %14 = math.tanh %13 : vector<32x256xf32>
    %c0_8 = arith.constant 0 : index
    %c0_9 = arith.constant 0 : index
    %15 = vector.load %arg4[%c0_8, %c0_9] : memref<32x32xf32, #tpu.memory_space<vmem>>, vector<32x32xf32>
    %cst = arith.constant dense<0.000000e+00> : vector<32x256xf32>
    %16 = tpu.matmul %15, %14, %cst {dimension_numbers = #tpu.dot_dimension_numbers<[1], [0], [0], [1], [0, 0, 1, 1], [], []>} : vector<32x32xf32>, vector<32x256xf32>, vector<32x256xf32> -> vector<32x256xf32>
    %c0_10 = arith.constant 0 : index
    %c0_11 = arith.constant 0 : index
    %17 = vector.load %arg5[%c0_10, %c0_11] : memref<32x1xf32, #tpu.memory_space<vmem>>, vector<32x1xf32>
    %18 = vector.broadcast %17 : vector<32x1xf32> to vector<32x256xf32>
    %19 = arith.addf %16, %18 : vector<32x256xf32>
    %20 = math.tanh %19 : vector<32x256xf32>
    %c0_12 = arith.constant 0 : index
    %c0_13 = arith.constant 0 : index
    %21 = vector.load %arg6[%c0_12, %c0_13] : memref<32x32xf32, #tpu.memory_space<vmem>>, vector<32x32xf32>
    %cst_14 = arith.constant dense<0.000000e+00> : vector<32x256xf32>
    %22 = tpu.matmul %21, %20, %cst_14 {dimension_numbers = #tpu.dot_dimension_numbers<[1], [0], [0], [1], [0, 0, 1, 1], [], []>} : vector<32x32xf32>, vector<32x256xf32>, vector<32x256xf32> -> vector<32x256xf32>
    %c0_15 = arith.constant 0 : index
    %c0_16 = arith.constant 0 : index
    %23 = vector.load %arg7[%c0_15, %c0_16] : memref<32x1xf32, #tpu.memory_space<vmem>>, vector<32x1xf32>
    %24 = vector.broadcast %23 : vector<32x1xf32> to vector<32x256xf32>
    %25 = arith.addf %22, %24 : vector<32x256xf32>
    %26 = math.tanh %25 : vector<32x256xf32>
    %c0_17 = arith.constant 0 : index
    %c0_18 = arith.constant 0 : index
    %27 = vector.load %arg8[%c0_17, %c0_18] : memref<32x1xf32, #tpu.memory_space<vmem>>, vector<32x1xf32>
    %28 = vector.broadcast %27 : vector<32x1xf32> to vector<32x256xf32>
    %29 = arith.mulf %28, %26 : vector<32x256xf32>
    %cst_19 = arith.constant dense<0.000000e+00> : vector<256xf32>
    %30 = vector.multi_reduction <add>, %29, %cst_19 [0] : vector<32x256xf32> to vector<256xf32>
    %31 = vector.shape_cast %30 : vector<256xf32> to vector<1x256xf32>
    %c0_20 = arith.constant 0 : index
    %c0_21 = arith.constant 0 : index
    %32 = vector.load %arg9[%c0_20, %c0_21] : memref<1x1xf32, #tpu.memory_space<vmem>>, vector<1x1xf32>
    %33 = vector.broadcast %32 : vector<1x1xf32> to vector<1x256xf32>
    %34 = arith.addf %31, %33 : vector<1x256xf32>
    %c0_22 = arith.constant 0 : index
    %c0_23 = arith.constant 0 : index
    %35 = vector.load %arg10[%c0_22, %c0_23] : memref<1x256xf32, #tpu.memory_space<vmem>>, vector<1x256xf32>
    tpu.vector_store %arg10[%c0_22, %c0_23], %34 {strides = array<i32>} : memref<1x256xf32, #tpu.memory_space<vmem>>, vector<1x256xf32>,
    return
  }
  func.func @transform_0(%arg0: i32) -> (i32, i32) {
    %c0_i32 = arith.constant 0 : i32
    %c0_i32_0 = arith.constant 0 : i32
    return %c0_i32, %arg0 : i32, i32
  }
  func.func @transform_1(%arg0: i32) -> (i32, i32) {
    %c0_i32 = arith.constant 0 : i32
    %c0_i32_0 = arith.constant 0 : i32
    %c0_i32_1 = arith.constant 0 : i32
    return %c0_i32, %c0_i32_0 : i32, i32
  }
  func.func @transform_2(%arg0: i32) -> (i32, i32) {
    %c0_i32 = arith.constant 0 : i32
    %c0_i32_0 = arith.constant 0 : i32
    %c0_i32_1 = arith.constant 0 : i32
    return %c0_i32, %c0_i32_0 : i32, i32
  }
  func.func @transform_3(%arg0: i32) -> (i32, i32) {
    %c0_i32 = arith.constant 0 : i32
    %c0_i32_0 = arith.constant 0 : i32
    %c0_i32_1 = arith.constant 0 : i32
    return %c0_i32, %c0_i32_0 : i32, i32
  }
  func.func @transform_4(%arg0: i32) -> (i32, i32) {
    %c0_i32 = arith.constant 0 : i32
    %c0_i32_0 = arith.constant 0 : i32
    %c0_i32_1 = arith.constant 0 : i32
    return %c0_i32, %c0_i32_0 : i32, i32
  }
  func.func @transform_5(%arg0: i32) -> (i32, i32) {
    %c0_i32 = arith.constant 0 : i32
    %c0_i32_0 = arith.constant 0 : i32
    %c0_i32_1 = arith.constant 0 : i32
    return %c0_i32, %c0_i32_0 : i32, i32
  }
  func.func @transform_6(%arg0: i32) -> (i32, i32) {
    %c0_i32 = arith.constant 0 : i32
    %c0_i32_0 = arith.constant 0 : i32
    %c0_i32_1 = arith.constant 0 : i32
    return %c0_i32, %c0_i32_0 : i32, i32
  }
  func.func @transform_7(%arg0: i32) -> (i32, i32) {
    %c0_i32 = arith.constant 0 : i32
    %c0_i32_0 = arith.constant 0 : i32
    %c0_i32_1 = arith.constant 0 : i32
    return %c0_i32, %c0_i32_0 : i32, i32
  }
  func.func @transform_8(%arg0: i32) -> (i32, i32) {
    %c0_i32 = arith.constant 0 : i32
    %c0_i32_0 = arith.constant 0 : i32
    %c0_i32_1 = arith.constant 0 : i32
    return %c0_i32, %c0_i32_0 : i32, i32
  }
  func.func @transform_9(%arg0: i32) -> (i32, i32) {
    %c0_i32 = arith.constant 0 : i32
    %c0_i32_0 = arith.constant 0 : i32
    return %c0_i32, %arg0 : i32, i32
  }
}

</mosaic_0001>

<bundles_post_ra>
// kernel: net_3hidden_forward.1
= control target key start
LH: loop header
LB: loop body
LE: loop exit
PB: predicated region body
PF: predicated region fallthrough
CT: control target
= control target key end

     0   :  { %s1041_s11 = smov 0   ;;  %s1176_s0 = inlined_call_operand.vmem [shape: f32[2,512], index: 0, kind: input, shape index: {}]   ;;  %s1177_s1 = inlined_call_operand.vmem [shape: f32[32,2], index: 1, kind: input, shape index: {}]   ;;  %s1178_s2 = inlined_call_operand.vmem [shape: f32[32,1], index: 2, kind: input, shape index: {}]   ;;  %s1179_s3 = inlined_call_operand.vmem [shape: f32[32,32], index: 3, kind: input, shape index: {}]   ;;  %s1180_s4 = inlined_call_operand.vmem [shape: f32[32,1], index: 4, kind: input, shape index: {}]   ;;  %s1181_s5 = inlined_call_operand.vmem [shape: f32[32,32], index: 5, kind: input, shape index: {}]   ;;  %s1182_s6 = inlined_call_operand.vmem [shape: f32[32,1], index: 6, kind: input, shape index: {}]   ;;  %s1183_s7 = inlined_call_operand.vmem [shape: f32[32,1], index: 7, kind: input, shape index: {}]   ;;  %s1184_s8 = inlined_call_operand.<no memory space> [shape: f32[1,1], index: 8, kind: input, shape index: {}]   ;;  %s1185_s9 = inlined_call_operand.vmem [shape: f32[1,512], index: 9, kind: output, shape index: {}]  }
   0x1   :  { %v14_v0 = vstv %s1184_s8 }
   0x2   :  { %15 = vst [vmem:[#allocation2] sm:$0x1] %v14_v0 }
   0x3 LB: > { %s875_s12 = sadd.s32 4294967295, %s982_s11   ;;  %p879_p0 = scmp.ge.s32.totalorder %s982_s11, 1  ;;  %s982_s11 = sphi %s1041_s11, %s21_s11  }
   0x4   : > { %p290_p1 = scmp.lt.s32.totalorder %s982_s11, 3 }
   0x6   : > { %p291_p2 = pnand %p879_p0, %p290_p1 }
   0x7   : > { %v338_v1 = vld [vmem:[%s1177_s1 + $0x10] sm:$0xff] (!%p291_p2)  ;;  %v336_v2 = vld [vmem:[%s1177_s1] sm:$0xff] (!%p291_p2)  ;;  %v984_v3 = vmov (!%p291_p2), 1   ;;  %v337_v4 = vld [vmem:[%s1177_s1 + $0x8] sm:$0xff] (!%p291_p2)  ;;  %v985_v5 = vmov (!%p291_p2), 0   ;;  %v986_v23 = vmov (!%p291_p2), 0.0   ;;  %v362_v25 = vlaneseq (!%p291_p2) }
   0x8   : > { %294 = sbr.rel (%p291_p2) target bundleno = 691 (0x2b3), region = 56  ;;  %924 = vset.pattern.permute.xlu0 (!%p291_p2), %v984_v3  ;;  %922 = vset.pattern.permute.xlu1 (!%p291_p2), %v984_v3  ;;  %v339_v6 = vld [vmem:[%s1177_s1 + $0x18] sm:$0xff] (!%p291_p2)  ;;  %v426_v7 = vld [vmem:[%s1178_s2 + $0x8] sm:$0xff] (!%p291_p2)  ;;  %v425_v8 = vld [vmem:[%s1178_s2] sm:$0xff] (!%p291_p2)  ;;  %s880_s13 = sshll.u32 (!%p291_p2), %s875_s12, 1  ;;  %vm493_vm0 = vcmask (!%p291_p2), 261120  }
   0x9   : > { %391 = vperm.xlu0 (!%p291_p2), %924, %v338_v1   ;;  %383 = vperm.xlu1 (!%p291_p2), %922, %v336_v2   ;;  %v469_v9 = vld [vmem:[%s1180_s4] sm:$0xff] (!%p291_p2)  ;;  %v427_v10 = vld [vmem:[%s1178_s2 + $0x10] sm:$0xff] (!%p291_p2)  ;;  %v428_v12 = vld [vmem:[%s1178_s2 + $0x18] sm:$0xff] (!%p291_p2)  ;;  %p326_p3 = scmp.lt.s32.totalorder (!%p291_p2), %s880_s13, 3  ;;  %v1117_v28 = vshrl.u32 (!%p291_p2), %v362_v25, 7  ;;  %vm822_vm1 = vcmp.lt.s32.totalorder (!%p291_p2), %v362_v25, 256 }
   0xa   : > { %v471_v11 = vld [vmem:[%s1180_s4 + $0x10] sm:$0xff] (!%p291_p2)  ;;  %v607_v13 = vld [vmem:[%s1182_s6] sm:$0xff] (!%p291_p2)  ;;  %v470_v14 = vld [vmem:[%s1180_s4 + $0x8] sm:$0xff] (!%p291_p2)  ;;  %570 = vmatprep.mubr.f32.mxu0 (!%p291_p2), %v986_v23  ;;  %707 = vmatprep.mubr.f32.mxu1 (!%p291_p2), %v986_v23 }
   0xb   : > { %v609_v15 = vld [vmem:[%s1182_s6 + $0x10] sm:$0xff] (!%p291_p2)  ;;  %v472_v16 = vld [vmem:[%s1180_s4 + $0x18] sm:$0xff] (!%p291_p2)  ;;  %v740_v17 = vld [vmem:[%s1183_s7] sm:$0xff] (!%p291_p2)  ;;  %v1123_v32 = vsub.s32 (!%p291_p2), 0, %v1117_v28  ;;  %v368_v33 = vsub.s32 (!%p291_p2), 1, %v1117_v28 }
   0xc   : > { %v608_v18 = vld [vmem:[%s1182_s6 + $0x8] sm:$0xff] (!%p291_p2)  ;;  %v742_v19 = vld [vmem:[%s1183_s7 + $0x10] sm:$0xff] (!%p291_p2)  ;;  %v610_v20 = vld [vmem:[%s1182_s6 + $0x18] sm:$0xff] (!%p291_p2) }
   0xd   : > { %925 = vset.pattern.permute.xlu0 (!%p291_p2), %v985_v5  ;;  %387 = vperm.xlu1 (!%p291_p2), %922, %v337_v4   ;;  %v790_v21 = vld [vmem:[#allocation2] sm:$0x1] (!%p291_p2)  ;;  %v741_v22 = vld [vmem:[%s1183_s7 + $0x8] sm:$0xff] (!%p291_p2)  ;;  %v743_v24 = vld [vmem:[%s1183_s7 + $0x18] sm:$0xff] (!%p291_p2) }
   0xe   : > { %343 = vperm.xlu0 (!%p291_p2), %925, %v336_v2  }
   0xf   : > { %s1187_s13 = smov (!%p326_p3, %s880_s13), 3 }
  0x10   : > { %s881_s14 = sshll.u32 %s1187_s13, 1  ;;  %s334_s15 = scalar_lea.vmem %s1185_s9, %s1187_s13 }
  0x11   : > { %923 = vset.pattern.permute.xlu1 %v985_v5  ;;  %s329_s16 = scalar_lea.vmem %s1176_s0, %s881_s14 }
  0x12   : > { %348 = vperm.xlu0 %925, %v337_v4   ;;  %358 = vperm.xlu1 %923, %v339_v6   ;;  %v340_v31 = vld [vmem:[%s329_s16] ss:$2 sm:$0x3]  ;;  %v883_v34 = vld [vmem:[%s329_s16 + $0x1] ss:$2 sm:$0x3] }
  0x13   : > { %v365_v35 = vrot.slane %v340_v31, %v1123_v32  ;;  %v369_v38 = vrot.slane %v340_v31, %v368_v33  ;;  %v402_v39 = vrot.slane %v883_v34, %v1123_v32  ;;  %v406_v40 = vrot.slane %v883_v34, %v368_v33  ;;  %v466_v31 = vld [vmem:[%s1179_s3 + $0x8] sm:$0xff]  ;;  %v467_v33 = vld [vmem:[%s1179_s3 + $0x10] sm:$0xff]  ;;  %v468_v34 = vld [vmem:[%s1179_s3 + $0x18] sm:$0xff] }
  0x16   : > { %353 = vperm.xlu0 %925, %v338_v1   ;;  %926 = vset.pattern.permute.xlu1 %v984_v3 }
  0x17   : > { %395 = vperm.xlu1 %926, %v339_v6  }
  0x1a   : > { %436 = vperm.xlu0 %925, %v426_v7  }
  0x1b   : > { %927 = vset.pattern.permute.xlu1 %v985_v5 }
  0x1c   : > { %431 = vperm.xlu1 %927, %v425_v8  }
  0x1e   : > { %475 = vperm.xlu0 %925, %v469_v9  }
  0x20   : > { %441 = vperm.xlu1 %927, %v427_v10  }
  0x22   : > { %485 = vperm.xlu0 %925, %v471_v11  }
  0x24   : > { %446 = vperm.xlu1 %927, %v428_v12  }
  0x26   : > { %613 = vperm.xlu0 %925, %v607_v13  }
  0x28   : > { %480 = vperm.xlu1 %927, %v470_v14  }
  0x2a   : > { %623 = vperm.xlu0 %925, %v609_v15  }
  0x2c   : > { %490 = vperm.xlu1 %927, %v472_v16  }
  0x2e   : > { %746 = vperm.xlu0 %925, %v740_v17  }
  0x30   : > { %618 = vperm.xlu1 %927, %v608_v18  }
  0x32   : > { %756 = vperm.xlu0 %925, %v742_v19  }
  0x34   : > { %628 = vperm.xlu1 %927, %v610_v20  }
  0x36   : > { %793 = vperm.xlu0 %925, %v790_v21  }
  0x38   : > { %751 = vperm.xlu1 %927, %v741_v22  }
  0x3c   : > { %761 = vperm.xlu1 %927, %v743_v24  }
  0x88   : > { %v384_v26 = vpop.permute.xlu1 %383  ;;  %v392_v27 = vpop.permute.xlu0 %391 }
  0x89   : > { %v409_v49 = vmul.f32 %v402_v39, %v384_v26  ;;  %v410_v50 = vmul.f32 %v406_v40, %v384_v26  ;;  %v413_v61 = vmul.f32 %v402_v39, %v392_v27  ;;  %v414_v0 = vmul.f32 %v406_v40, %v392_v27 }
  0x8c   : > { %v388_v29 = vpop.permute.xlu1 %387 }
  0x8d   : > { %v344_v30 = vpop.permute.xlu0 %343  ;;  %v411_v45 = vmul.f32 %v402_v39, %v388_v29  ;;  %v412_v46 = vmul.f32 %v406_v40, %v388_v29 }
  0x8e   : > { %v372_v43 = vmul.f32 %v365_v35, %v344_v30  ;;  %v373_v47 = vmul.f32 %v369_v38, %v344_v30  ;;  %v465_v30 = vld [vmem:[%s1179_s3] sm:$0xff] }
  0x90   : > { %v417_v54 = vadd.f32 %v409_v49, %v372_v43  ;;  %v418_v58 = vadd.f32 %v410_v50, %v373_v47 }
  0x91   : > { %v349_v36 = vpop.permute.xlu0 %348  ;;  %v359_v37 = vpop.permute.xlu1 %358 }
  0x92   : > { %v374_v41 = vmul.f32 %v365_v35, %v349_v36  ;;  %v375_v42 = vmul.f32 %v369_v38, %v349_v36  ;;  %v378_v6 = vmul.f32 %v365_v35, %v359_v37  ;;  %v379_v7 = vmul.f32 %v369_v38, %v359_v37 }
  0x94   : > { %v419_v51 = vadd.f32 %v411_v45, %v374_v41  ;;  %v420_v52 = vadd.f32 %v412_v46, %v375_v42 }
  0x95   : > { %v354_v44 = vpop.permute.xlu0 %353 }
  0x96   : > { %v396_v48 = vpop.permute.xlu1 %395  ;;  %v376_v55 = vmul.f32 %v365_v35, %v354_v44  ;;  %v377_v59 = vmul.f32 %v369_v38, %v354_v44 }
  0x97   : > { %v415_v1 = vmul.f32 %v402_v39, %v396_v48  ;;  %v416_v2 = vmul.f32 %v406_v40, %v396_v48 }
  0x98   : > { %v421_v3 = vadd.f32 %v413_v61, %v376_v55  ;;  %v422_v5 = vadd.f32 %v414_v0, %v377_v59 }
  0x99   : > { %v437_v53 = vpop.permute.xlu0 %436  ;;  %v423_v10 = vadd.f32 %v415_v1, %v378_v6  ;;  %v424_v11 = vadd.f32 %v416_v2, %v379_v7  ;;  %v606_v6 = vld [vmem:[%s1181_s5 + $0x18] sm:$0xff] }
  0x9a   : > { %v451_v56 = vadd.f32 %v437_v53, %v419_v51  ;;  %v452_v57 = vadd.f32 %v437_v53, %v420_v52 }
  0x9b   : > { %v432_v60 = vpop.permute.xlu1 %431 }
  0x9c   : > { %928 = vtanh.f32 %v451_v56  ;;  %v449_v62 = vadd.f32 %v432_v60, %v417_v54  ;;  %v450_v63 = vadd.f32 %v432_v60, %v418_v58 }
  0x9d   : > { %930 = vtanh.f32 %v452_v57  ;;  %v476_v35 = vpop.permute.xlu0 %475 }
  0x9e   : > { %932 = vtanh.f32 %v449_v62 }
  0x9f   : > { %934 = vtanh.f32 %v450_v63  ;;  %v442_v4 = vpop.permute.xlu1 %441 }
  0xa0   : > { %v453_v8 = vadd.f32 %v442_v4, %v421_v3  ;;  %v454_v9 = vadd.f32 %v442_v4, %v422_v5  ;;  %v603_v3 = vld [vmem:[%s1181_s5] sm:$0xff]  ;;  %v604_v4 = vld [vmem:[%s1181_s5 + $0x8] sm:$0xff]  ;;  %v605_v5 = vld [vmem:[%s1181_s5 + $0x10] sm:$0xff] }
  0xa1   : > { %v486_v45 = vpop.permute.xlu0 %485 }
  0xa2   : > { %936 = vtanh.f32 %v453_v8 }
  0xa3   : > { %v447_v12 = vpop.permute.xlu1 %446  ;;  %938 = vtanh.f32 %v454_v9 }
  0xa4   : > { %v455_v13 = vadd.f32 %v447_v12, %v423_v10  ;;  %v456_v14 = vadd.f32 %v447_v12, %v424_v11 }
  0xa5   : > { %v614_v7 = vpop.permute.xlu0 %613 }
  0xa6   : > { %v929_v15 = vpop.eup %928  ;;  %940 = vtanh.f32 %v455_v13 }
  0xa7   : > { %v931_v16 = vpop.eup %930  ;;  %942 = vtanh.f32 %v456_v14  ;;  %v481_v40 = vpop.permute.xlu1 %480 }
  0xa8   : > { %v933_v17 = vpop.eup %932 }
  0xa9   : > { %v935_v18 = vpop.eup %934  ;;  %v896_v19 = vpack.c.bf16 %v929_v15, %v933_v17 }
  0xaa   : > { %v894_v20 = vpack.c.bf16 %v931_v16, %v935_v18 }
  0xab   : > { %v491_v50 = vpop.permute.xlu1 %490 }
  0xac   : > { %895 = vmatprep.subr.bf16.mxu0 %v894_v20  ;;  %v937_v21 = vpop.eup %936 }
  0xad   : > { %897 = vmatpush1.bf16.msra.mxu0 %v896_v19  ;;  %v939_v22 = vpop.eup %938 }
  0xaf   : > { %v619_v12 = vpop.permute.xlu1 %618 }
  0xb0   : > { %v941_v24 = vpop.eup %940 }
  0xb1   : > { %v943_v26 = vpop.eup %942  ;;  %v900_v27 = vpack.c.bf16 %v941_v24, %v937_v21 }
  0xb2   : > { %v898_v29 = vpack.c.bf16 %v943_v26, %v939_v22 }
  0xb3   : > { %v629_v21 = vpop.permute.xlu1 %628 }
  0xb4   : > { %899 = vmatprep.subr.bf16.mxu0 %v898_v29 }
  0xb5   : > { %901 = vmatpush1.bf16.msra.mxu0 %v900_v27 }
  0xb8   : > { %884 = vmatmul.mubr.msk.f32.vlgmr.msra.gmra.mrb[0].mxu0 %vm493_vm0, %v465_v30 }
  0xb9   : > { %576 = vmatprep.mubr.f32.mxu0 %v986_v23 }
  0xbc   : > { %885 = vmatmul.mubr.msk.f32.gmra.mrb[2].mxu0 %vm493_vm0, %v466_v31 }
  0xbd   : > { %582 = vmatprep.mubr.f32.mxu0 %v986_v23 }
  0xc0   : > { %886 = vmatmul.mubr.msk.f32.gmra.mrb[4].mxu0 %vm493_vm0, %v467_v33 }
  0xc1   : > { %588 = vmatprep.mubr.f32.mxu0 %v986_v23 }
  0xc4   : > { %887 = vmatmul.mubr.msk.f32.gmra.mrb[6].mxu0 %vm493_vm0, %v468_v34  ;;  %v752_v34 = vpop.permute.xlu1 %751 }
 0x18b   : > { %v572_v36 = vpop.f32.mrb[0].mxu0 }
 0x18c   : > { %v573_v37 = vadd.f32 %v572_v36, %v476_v35  ;;  %v574_v38 = vpop.f32.mrb[1].mxu0 }
 0x18d   : > { %v575_v39 = vadd.f32 %v574_v38, %v476_v35 }
 0x18e   : > { %944 = vtanh.f32 %v573_v37 }
 0x18f   : > { %v578_v41 = vpop.f32.mrb[2].mxu0  ;;  %946 = vtanh.f32 %v575_v39 }
 0x190   : > { %v579_v42 = vadd.f32 %v578_v41, %v481_v40  ;;  %v580_v43 = vpop.f32.mrb[3].mxu0 }
 0x191   : > { %v581_v44 = vadd.f32 %v580_v43, %v481_v40 }
 0x192   : > { %948 = vtanh.f32 %v579_v42 }
 0x193   : > { %950 = vtanh.f32 %v581_v44  ;;  %v584_v46 = vpop.f32.mrb[4].mxu0 }
 0x194   : > { %v585_v47 = vadd.f32 %v584_v46, %v486_v45  ;;  %v586_v48 = vpop.f32.mrb[5].mxu0 }
 0x195   : > { %v587_v49 = vadd.f32 %v586_v48, %v486_v45 }
 0x196   : > { %952 = vtanh.f32 %v585_v47 }
 0x197   : > { %v590_v51 = vpop.f32.mrb[6].mxu0  ;;  %954 = vtanh.f32 %v587_v49  ;;  %v762_v49 = vpop.permute.xlu1 %761 }
 0x198   : > { %v591_v52 = vadd.f32 %v590_v51, %v491_v50  ;;  %v592_v53 = vpop.f32.mrb[7].mxu0  ;;  %v945_v55 = vpop.eup %944 }
 0x199   : > { %v593_v54 = vadd.f32 %v592_v53, %v491_v50  ;;  %v947_v56 = vpop.eup %946 }
 0x19a   : > { %956 = vtanh.f32 %v591_v52 }
 0x19b   : > { %958 = vtanh.f32 %v593_v54 }
 0x19c   : > { %v949_v57 = vpop.eup %948 }
 0x19d   : > { %v951_v58 = vpop.eup %950  ;;  %v904_v59 = vpack.c.bf16 %v949_v57, %v945_v55 }
 0x19e   : > { %v902_v60 = vpack.c.bf16 %v951_v58, %v947_v56 }
 0x1a0   : > { %903 = vmatprep.subr.bf16.mxu1 %v902_v60  ;;  %v953_v61 = vpop.eup %952 }
 0x1a1   : > { %905 = vmatpush1.bf16.msra.mxu1 %v904_v59  ;;  %v955_v62 = vpop.eup %954 }
 0x1a4   : > { %v957_v63 = vpop.eup %956 }
 0x1a5   : > { %v959_v0 = vpop.eup %958  ;;  %v908_v1 = vpack.c.bf16 %v957_v63, %v953_v61  ;;  %v987_v61 = vmov 1966171168  }
 0x1a6   : > { %v906_v2 = vpack.c.bf16 %v959_v0, %v955_v62  ;;  %v806_v62 = vunpack.c.l.s4 %v987_v61 }
 0x1a8   : > { %907 = vmatprep.subr.bf16.mxu1 %v906_v2 }
 0x1a9   : > { %909 = vmatpush1.bf16.msra.mxu1 %v908_v1 }
 0x1ac   : > { %888 = vmatmul.mubr.msk.f32.vlgmr.msra.gmra.mrb[0].mxu1 %vm493_vm0, %v603_v3 }
 0x1ad   : > { %713 = vmatprep.mubr.f32.mxu1 %v986_v23 }
 0x1b0   : > { %889 = vmatmul.mubr.msk.f32.gmra.mrb[2].mxu1 %vm493_vm0, %v604_v4  ;;  %v807_v4 = vunpack.c.0.s8 %v806_v62 }
 0x1b1   : > { %719 = vmatprep.mubr.f32.mxu1 %v986_v23 }
 0x1b4   : > { %890 = vmatmul.mubr.msk.f32.gmra.mrb[4].mxu1 %vm493_vm0, %v605_v5 }
 0x1b5   : > { %725 = vmatprep.mubr.f32.mxu1 %v986_v23  ;;  %v624_v23 = vpop.permute.xlu0 %623 }
 0x1b8   : > { %891 = vmatmul.mubr.msk.f32.gmra.mrb[6].mxu1 %vm493_vm0, %v606_v6 }
 0x1b9   : > { %v747_v30 = vpop.permute.xlu0 %746 }
 0x1bd   : > { %v757_v42 = vpop.permute.xlu0 %756 }
 0x1c1   : > { %v794_v1 = vpop.permute.xlu0 %793 }
 0x1c2   : > { %v799_v6 = vrot.slane %v794_v1, %v1123_v32 }
 0x27f   : > { %v709_v8 = vpop.f32.mrb[0].mxu1 }
 0x280   : > { %v710_v9 = vadd.f32 %v709_v8, %v614_v7  ;;  %v711_v10 = vpop.f32.mrb[1].mxu1 }
 0x281   : > { %v712_v11 = vadd.f32 %v711_v10, %v614_v7  ;;  %v810_v10 = vsub.s32 %v807_v4, %v1117_v28 }
 0x282   : > { %960 = vtanh.f32 %v710_v9 }
 0x283   : > { %v715_v13 = vpop.f32.mrb[2].mxu1  ;;  %962 = vtanh.f32 %v712_v11 }
 0x284   : > { %v716_v14 = vadd.f32 %v715_v13, %v619_v12  ;;  %v717_v15 = vpop.f32.mrb[3].mxu1 }
 0x285   : > { %v718_v16 = vadd.f32 %v717_v15, %v619_v12 }
 0x286   : > { %964 = vtanh.f32 %v716_v14 }
 0x287   : > { %966 = vtanh.f32 %v718_v16  ;;  %v721_v17 = vpop.f32.mrb[4].mxu1 }
 0x288   : > { %v722_v18 = vadd.f32 %v721_v17, %v624_v23  ;;  %v723_v19 = vpop.f32.mrb[5].mxu1 }
 0x289   : > { %v724_v20 = vadd.f32 %v723_v19, %v624_v23 }
 0x28a   : > { %968 = vtanh.f32 %v722_v18 }
 0x28b   : > { %970 = vtanh.f32 %v724_v20  ;;  %v727_v22 = vpop.f32.mrb[6].mxu1 }
 0x28c   : > { %v728_v24 = vadd.f32 %v727_v22, %v629_v21  ;;  %v729_v26 = vpop.f32.mrb[7].mxu1  ;;  %v961_v29 = vpop.eup %960 }
 0x28d   : > { %v730_v27 = vadd.f32 %v729_v26, %v629_v21  ;;  %v963_v31 = vpop.eup %962  ;;  %v764_v36 = vmul.f32 %v961_v29, %v747_v30 }
 0x28e   : > { %972 = vtanh.f32 %v728_v24  ;;  %v765_v38 = vmul.f32 %v963_v31, %v747_v30 }
 0x28f   : > { %974 = vtanh.f32 %v730_v27 }
 0x290   : > { %v965_v33 = vpop.eup %964 }
 0x291   : > { %v967_v35 = vpop.eup %966  ;;  %v766_v37 = vmul.f32 %v965_v33, %v752_v34 }
 0x292   : > { %v767_v39 = vmul.f32 %v967_v35, %v752_v34 }
 0x293   : > { %v772_v40 = vadd.f32 %v766_v37, %v764_v36 }
 0x294   : > { %v969_v41 = vpop.eup %968  ;;  %v781_v43 = vadd.f32 %v767_v39, %v765_v38 }
 0x295   : > { %v971_v44 = vpop.eup %970  ;;  %v768_v45 = vmul.f32 %v969_v41, %v757_v42 }
 0x296   : > { %v769_v46 = vmul.f32 %v971_v44, %v757_v42 }
 0x297   : > { %v773_v47 = vadd.f32 %v772_v40, %v768_v45 }
 0x298   : > { %v973_v48 = vpop.eup %972  ;;  %v782_v50 = vadd.f32 %v781_v43, %v769_v46 }
 0x299   : > { %v975_v51 = vpop.eup %974  ;;  %v770_v52 = vmul.f32 %v973_v48, %v762_v49 }
 0x29a   : > { %v771_v53 = vmul.f32 %v975_v51, %v762_v49 }
 0x29b   : > { %v774_v54 = vadd.f32 %v773_v47, %v770_v52 }
 0x29c   : > { %v783_v55 = vadd.f32 %v782_v50, %v771_v53 }
 0x29d   : > { %v775_v56 = vrot.slane %v774_v54, 4 }
 0x29e   : > { %v784_v57 = vrot.slane %v783_v55, 4 }
 0x29f   : > { %v776_v58 = vadd.f32 %v775_v56, %v774_v54 }
 0x2a0   : > { %v785_v59 = vadd.f32 %v784_v57, %v783_v55 }
 0x2a1   : > { %v777_v60 = vrot.slane %v776_v58, 2 }
 0x2a2   : > { %v786_v63 = vrot.slane %v785_v59, 2 }
 0x2a3   : > { %v778_v0 = vadd.f32 %v777_v60, %v776_v58 }
 0x2a4   : > { %v787_v2 = vadd.f32 %v786_v63, %v785_v59 }
 0x2a5   : > { %v779_v3 = vrot.slane %v778_v0, 1 }
 0x2a6   : > { %v788_v5 = vrot.slane %v787_v2, 1 }
 0x2a7   : > { %v780_v7 = vadd.f32 %v779_v3, %v778_v0 }
 0x2a8   : > { %v789_v8 = vadd.f32 %v788_v5, %v787_v2 }
 0x2a9   : > { %v800_v9 = vadd.f32 %v799_v6, %v780_v7 }
 0x2aa   : > { %v801_v11 = vadd.f32 %v799_v6, %v789_v8 }
 0x2ac   : > { %v804_v12 = vcombine.low %v800_v9, %v801_v11 }
 0x2ae   : > { %v811_v13 = vrot.slane %v804_v12, %v810_v10 }
 0x2b0   : > { %v818_v14 = vrot.slane %v811_v13, %v810_v10 }
 0x2b2   : > { %824 = vst.msk [vmem:[%s334_s15] sm:$0x3] %vm822_vm1, %v818_v14 }
 0x2b3 PF: > { %s21_s11 = sadd.s32 1, %s982_s11  }
 0x2b4   : > { %p18_p4 = scmp.ge.s32.totalorder %s21_s11, 4  }
 0x2b6   :  { %20 = sbr.rel (!%p18_p4) target bundleno = 3 (0x3), region = 87 }

</bundles_post_ra>
